<compile_context>
chip_gen: v5e
topology: v5e:2x2
jax: 0.10.0
libtpu: 0.0.40
codegen_flags: <defaults>
</compile_context>

<pallas_src>
import jax
import jax.numpy as jnp
from jax.experimental import pallas as pl
from jax.experimental.pallas import tpu as pltpu


# ------------------------------- Pallas kernel -------------------------------
def make_se_kernel(B, H, W, C, Cr):
    del Cr  # implied by weight shapes

    def kernel(x_ref, fold_ref, w1_ref, b1_ref, w2_ref, b2_ref, o_ref):
        xs = x_ref[...]                                             # (B, H, WC)

        # ---- global average pool -> (B, C) ----
        # sublane reduce over H, then W-fold + 1/(H*W) scale via one MXU matmul
        col = jnp.sum(xs, axis=1)                                   # (B, WC)
        pooled = jnp.dot(col, fold_ref[...],
                         preferred_element_type=jnp.float32)        # (B, C)

        # ---- squeeze: 1x1 conv (BN1 folded) + ReLU ----
        h = jnp.dot(pooled, w1_ref[...],
                    preferred_element_type=jnp.float32) + b1_ref[...]   # (B, Cr)
        h = jnp.maximum(h, 0.0)

        # ---- excite: 1x1 conv (BN2 folded) + HSigmoid ----
        g = jnp.dot(h, w2_ref[...],
                    preferred_element_type=jnp.float32) + b2_ref[...]   # (B, C)
        g = jnp.minimum(jnp.maximum(g + 3.0, 0.0), 6.0) * (1.0 / 6.0)

        # ---- apply gate: replicate per-channel gate across W inside lanes ----
        g_w = jnp.tile(g, (1, W))                                   # (B, WC)
        o_ref[...] = xs * g_w[:, None, :]                           # broadcast over H

    return kernel


def se_forward_pallas(x, p, *, max_block_bytes=2 << 20):
    """x: (N, H, W, C) float32 NHWC.  p: folded params {w1, b1, w2, b2}."""
    N, H, W, C = x.shape
    Cr = p["w1"].shape[1]
    WC = W * C

    x3 = x.reshape(N, H, WC)                     # free view, lane-dense slab

    # Batch-tile size: largest divisor of N whose slab fits the block budget.
    per_image_bytes = H * WC * 4
    B = int(min(N, max(1, max_block_bytes // per_image_bytes)))
    while N % B != 0:
        B -= 1
    grid = (N // B,)

    # Constant (WC, C) fold matrix: W stacked CxC identities scaled by 1/(H*W).
    fold = jnp.tile(jnp.eye(C, dtype=jnp.float32), (W, 1)) * (1.0 / float(H * W))

    params = [fold, p["w1"], p["b1"], p["w2"], p["b2"]]

    in_specs = [pl.BlockSpec((B, H, WC), lambda n: (n, 0, 0))]
    for arr in params:
        nd = arr.ndim
        in_specs.append(pl.BlockSpec(arr.shape, lambda n, _nd=nd: (0,) * _nd))

    out_specs = pl.BlockSpec((B, H, WC), lambda n: (n, 0, 0))

    kernel = make_se_kernel(B, H, W, C, Cr)

    out = pl.pallas_call(
        kernel,
        out_shape=jax.ShapeDtypeStruct((N, H, WC), jnp.float32),
        grid_spec=pltpu.PrefetchScalarGridSpec(
            num_scalar_prefetch=0,
            grid=grid,
            in_specs=in_specs,
            out_specs=out_specs,
        ),
        compiler_params=pltpu.CompilerParams(
            dimension_semantics=("parallel",),
            vmem_limit_bytes=32 << 20,
        ),
        input_output_aliases={0: 0},   # output slab may reuse x3's HBM buffer
    )(x3, *params)

    return out.reshape(N, H, W, C)


# ----------------------------- pure-JAX reference -----------------------------
def ref_forward(x, raw, eps=1e-5):
    """Reference with un-folded BN params (NHWC)."""
    def bn(y, g, b, m, v):
        return (y - m) / jnp.sqrt(v + eps) * g + b

    pooled = jnp.mean(x, axis=(1, 2))                       # (N, C)
    h = pooled @ raw["w1"]                                  # (N, Cr)
    h = jnp.maximum(bn(h, *raw["bn1"]), 0.0)
    g = h @ raw["w2"]                                       # (N, C)
    g = bn(g, *raw["bn2"])
    g = jnp.clip(g + 3.0, 0.0, 6.0) / 6.0                   # hard-sigmoid
    return x * g[:, None, None, :]


# ----------------------------- parameter setup -----------------------------
def fold_bn(gamma, beta, mean, var, eps=1e-5):
    scale = gamma / jnp.sqrt(var + eps)
    bias = beta - mean * scale
    return scale, bias


def init_params(key, C, Cr):
    ks = jax.random.split(key, 4)

    def bn_params(k, n):
        k1, k2, k3, k4 = jax.random.split(k, 4)
        gamma = 1.0 + 0.1 * jax.random.normal(k1, (n,), jnp.float32)
        beta = 0.1 * jax.random.normal(k2, (n,), jnp.float32)
        mean = 0.1 * jax.random.normal(k3, (n,), jnp.float32)
        var = 1.0 + 0.5 * jax.random.uniform(k4, (n,), jnp.float32)
        return (gamma, beta, mean, var)

    raw = {
        "w1": 0.2 * jax.random.normal(ks[0], (C, Cr), jnp.float32),
        "bn1": bn_params(ks[1], Cr),
        "w2": 0.2 * jax.random.normal(ks[2], (Cr, C), jnp.float32),
        "bn2": bn_params(ks[3], C),
    }

    s1, b1 = fold_bn(*raw["bn1"])
    s2, b2 = fold_bn(*raw["bn2"])
    folded = {
        "w1": raw["w1"] * s1[None, :],   # fold BN scale into conv1 columns
        "b1": b1.reshape(1, -1),
        "w2": raw["w2"] * s2[None, :],   # fold BN scale into conv2 columns
        "b2": b2.reshape(1, -1),
    }
    return raw, folded


if __name__ == "__main__":
    # SeModule(in_size=32, reduction=4)  -> squeeze channels = 8
    # NHWC input (2, 16, 16, 32)  ==  PyTorch NCHW (2, 32, 16, 16)
    N, H, W = 2, 16, 16
    C, reduction = 32, 4
    Cr = C // reduction

    key = jax.random.PRNGKey(0)
    kx, kp = jax.random.split(key)
    x = jax.random.normal(kx, (N, H, W, C), jnp.float32)
    raw, folded = init_params(kp, C, Cr)

    # compute reference first (defensive w.r.t. input/output aliasing)
    ref = jax.block_until_ready(ref_forward(x, raw))

    out = se_forward_pallas(x, folded)
    out = jax.block_until_ready(out)

    assert out.shape == (N, H, W, C)
    err = float(jnp.max(jnp.abs(out - ref)))
    assert jnp.allclose(out, ref, atol=1e-4, rtol=1e-4), err

    print("KERNEL_OK")
</pallas_src>

<mosaic_0001>
module attributes {stable_mosaic.version = 11 : i64} {
  func.func @kernel(%arg0: i32, %arg1: memref<2x16x512xf32, #tpu.memory_space<vmem>>, %arg2: memref<512x32xf32, #tpu.memory_space<vmem>>, %arg3: memref<32x8xf32, #tpu.memory_space<vmem>>, %arg4: memref<1x8xf32, #tpu.memory_space<vmem>>, %arg5: memref<8x32xf32, #tpu.memory_space<vmem>>, %arg6: memref<1x32xf32, #tpu.memory_space<vmem>>, %arg7: memref<2x16x512xf32, #tpu.memory_space<vmem>>) attributes {dimension_semantics = [#tpu.dimension_semantics<parallel>], iteration_bounds = array<i64: 1>, scalar_prefetch = 0 : i64, scratch_operands = 0 : i64, tpu.core_type = #tpu.core_type<tc>, window_params = [{transform_indices = @transform_0, window_bounds = array<i64: 2, 16, 512>}, {pipeline_mode = #tpu.pipeline_mode<synchronous>, transform_indices = @transform_1, window_bounds = array<i64: 512, 32>}, {pipeline_mode = #tpu.pipeline_mode<synchronous>, transform_indices = @transform_2, window_bounds = array<i64: 32, 8>}, {pipeline_mode = #tpu.pipeline_mode<synchronous>, transform_indices = @transform_3, window_bounds = array<i64: 1, 8>}, {pipeline_mode = #tpu.pipeline_mode<synchronous>, transform_indices = @transform_4, window_bounds = array<i64: 8, 32>}, {pipeline_mode = #tpu.pipeline_mode<synchronous>, transform_indices = @transform_5, window_bounds = array<i64: 1, 32>}, {transform_indices = @transform_6, window_bounds = array<i64: 2, 16, 512>}]} {
    %c0 = arith.constant 0 : index
    %c0_0 = arith.constant 0 : index
    %c0_1 = arith.constant 0 : index
    %0 = vector.load %arg1[%c0, %c0_0, %c0_1] : memref<2x16x512xf32, #tpu.memory_space<vmem>>, vector<2x16x512xf32>
    %cst = arith.constant dense<0.000000e+00> : vector<2x512xf32>
    %1 = vector.multi_reduction <add>, %0, %cst [1] : vector<2x16x512xf32> to vector<2x512xf32>
    %c0_2 = arith.constant 0 : index
    %c0_3 = arith.constant 0 : index
    %2 = vector.load %arg2[%c0_2, %c0_3] : memref<512x32xf32, #tpu.memory_space<vmem>>, vector<512x32xf32>
    %cst_4 = arith.constant dense<0.000000e+00> : vector<2x32xf32>
    %3 = tpu.matmul %1, %2, %cst_4 {dimension_numbers = #tpu.dot_dimension_numbers<[1], [0], [0], [1], [0, 0, 1, 1], [], []>} : vector<2x512xf32>, vector<512x32xf32>, vector<2x32xf32> -> vector<2x32xf32>
    %c0_5 = arith.constant 0 : index
    %c0_6 = arith.constant 0 : index
    %4 = vector.load %arg3[%c0_5, %c0_6] : memref<32x8xf32, #tpu.memory_space<vmem>>, vector<32x8xf32>
    %cst_7 = arith.constant dense<0.000000e+00> : vector<2x8xf32>
    %5 = tpu.matmul %3, %4, %cst_7 {dimension_numbers = #tpu.dot_dimension_numbers<[1], [0], [0], [1], [0, 0, 1, 1], [], []>} : vector<2x32xf32>, vector<32x8xf32>, vector<2x8xf32> -> vector<2x8xf32>
    %c0_8 = arith.constant 0 : index
    %c0_9 = arith.constant 0 : index
    %6 = vector.load %arg4[%c0_8, %c0_9] : memref<1x8xf32, #tpu.memory_space<vmem>>, vector<1x8xf32>
    %7 = vector.broadcast %6 : vector<1x8xf32> to vector<2x8xf32>
    %8 = arith.addf %5, %7 : vector<2x8xf32>
    %cst_10 = arith.constant 0.000000e+00 : f32
    %9 = vector.broadcast %cst_10 : f32 to vector<2x8xf32>
    %10 = arith.maximumf %8, %9 : vector<2x8xf32>
    %c0_11 = arith.constant 0 : index
    %c0_12 = arith.constant 0 : index
    %11 = vector.load %arg5[%c0_11, %c0_12] : memref<8x32xf32, #tpu.memory_space<vmem>>, vector<8x32xf32>
    %cst_13 = arith.constant dense<0.000000e+00> : vector<2x32xf32>
    %12 = tpu.matmul %10, %11, %cst_13 {dimension_numbers = #tpu.dot_dimension_numbers<[1], [0], [0], [1], [0, 0, 1, 1], [], []>} : vector<2x8xf32>, vector<8x32xf32>, vector<2x32xf32> -> vector<2x32xf32>
    %c0_14 = arith.constant 0 : index
    %c0_15 = arith.constant 0 : index
    %13 = vector.load %arg6[%c0_14, %c0_15] : memref<1x32xf32, #tpu.memory_space<vmem>>, vector<1x32xf32>
    %14 = vector.broadcast %13 : vector<1x32xf32> to vector<2x32xf32>
    %15 = arith.addf %12, %14 : vector<2x32xf32>
    %cst_16 = arith.constant 3.000000e+00 : f32
    %16 = vector.broadcast %cst_16 : f32 to vector<2x32xf32>
    %17 = arith.addf %15, %16 : vector<2x32xf32>
    %cst_17 = arith.constant 0.000000e+00 : f32
    %18 = vector.broadcast %cst_17 : f32 to vector<2x32xf32>
    %19 = arith.maximumf %17, %18 : vector<2x32xf32>
    %cst_18 = arith.constant 6.000000e+00 : f32
    %20 = vector.broadcast %cst_18 : f32 to vector<2x32xf32>
    %21 = arith.minimumf %19, %20 : vector<2x32xf32>
    %cst_19 = arith.constant 0.166666672 : f32
    %22 = vector.broadcast %cst_19 : f32 to vector<2x32xf32>
    %23 = arith.mulf %21, %22 : vector<2x32xf32>
    %24 = tpu.concatenate %23, %23, %23, %23, %23, %23, %23, %23, %23, %23, %23, %23, %23, %23, %23, %23 in 1 : vector<2x32xf32>, vector<2x32xf32>, vector<2x32xf32>, vector<2x32xf32>, vector<2x32xf32>, vector<2x32xf32>, vector<2x32xf32>, vector<2x32xf32>, vector<2x32xf32>, vector<2x32xf32>, vector<2x32xf32>, vector<2x32xf32>, vector<2x32xf32>, vector<2x32xf32>, vector<2x32xf32>, vector<2x32xf32> -> vector<2x512xf32>
    %25 = vector.shape_cast %24 : vector<2x512xf32> to vector<2x1x512xf32>
    %26 = vector.broadcast %25 : vector<2x1x512xf32> to vector<2x16x512xf32>
    %27 = arith.mulf %0, %26 : vector<2x16x512xf32>
    %c0_20 = arith.constant 0 : index
    %c0_21 = arith.constant 0 : index
    %c0_22 = arith.constant 0 : index
    %28 = vector.load %arg7[%c0_20, %c0_21, %c0_22] : memref<2x16x512xf32, #tpu.memory_space<vmem>>, vector<2x16x512xf32>
    tpu.vector_store %arg7[%c0_20, %c0_21, %c0_22], %27 {strides = array<i32>} : memref<2x16x512xf32, #tpu.memory_space<vmem>>, vector<2x16x512xf32>,
    return
  }
  func.func @transform_0(%arg0: i32) -> (i32, i32, i32) {
    %c0_i32 = arith.constant 0 : i32
    %c0_i32_0 = arith.constant 0 : i32
    %c0_i32_1 = arith.constant 0 : i32
    return %arg0, %c0_i32, %c0_i32_0 : i32, i32, i32
  }
  func.func @transform_1(%arg0: i32) -> (i32, i32) {
    %c0_i32 = arith.constant 0 : i32
    %c0_i32_0 = arith.constant 0 : i32
    %c0_i32_1 = arith.constant 0 : i32
    return %c0_i32, %c0_i32_0 : i32, i32
  }
  func.func @transform_2(%arg0: i32) -> (i32, i32) {
    %c0_i32 = arith.constant 0 : i32
    %c0_i32_0 = arith.constant 0 : i32
    %c0_i32_1 = arith.constant 0 : i32
    return %c0_i32, %c0_i32_0 : i32, i32
  }
  func.func @transform_3(%arg0: i32) -> (i32, i32) {
    %c0_i32 = arith.constant 0 : i32
    %c0_i32_0 = arith.constant 0 : i32
    %c0_i32_1 = arith.constant 0 : i32
    return %c0_i32, %c0_i32_0 : i32, i32
  }
  func.func @transform_4(%arg0: i32) -> (i32, i32) {
    %c0_i32 = arith.constant 0 : i32
    %c0_i32_0 = arith.constant 0 : i32
    %c0_i32_1 = arith.constant 0 : i32
    return %c0_i32, %c0_i32_0 : i32, i32
  }
  func.func @transform_5(%arg0: i32) -> (i32, i32) {
    %c0_i32 = arith.constant 0 : i32
    %c0_i32_0 = arith.constant 0 : i32
    %c0_i32_1 = arith.constant 0 : i32
    return %c0_i32, %c0_i32_0 : i32, i32
  }
  func.func @transform_6(%arg0: i32) -> (i32, i32, i32) {
    %c0_i32 = arith.constant 0 : i32
    %c0_i32_0 = arith.constant 0 : i32
    %c0_i32_1 = arith.constant 0 : i32
    return %arg0, %c0_i32, %c0_i32_0 : i32, i32, i32
  }
}

</mosaic_0001>

<bundles_post_ra>
// kernel: tpu_custom_call.1
= control target key start
LH: loop header
LB: loop body
LE: loop exit
PB: predicated region body
PF: predicated region fallthrough
CT: control target
= control target key end

     0   :  { %11 = vsyncpa [#allocation3], 0  ;;  %s837_s0 = inlined_call_operand.hbm [shape: f32[2,16,512], index: 0, kind: input, shape index: {}, may-alias: {0,6}]   ;;  %s838_s1 = inlined_call_operand.vmem [shape: f32[512,32], index: 1, kind: input, shape index: {}]   ;;  %s839_s2 = inlined_call_operand.vmem [shape: f32[32,8], index: 2, kind: input, shape index: {}]   ;;  %s840_s3 = inlined_call_operand.vmem [shape: f32[1,8], index: 3, kind: input, shape index: {}]   ;;  %s841_s4 = inlined_call_operand.vmem [shape: f32[8,32], index: 4, kind: input, shape index: {}]   ;;  %s842_s5 = inlined_call_operand.vmem [shape: f32[1,32], index: 5, kind: input, shape index: {}]   ;;  %s843_s6 = inlined_call_operand.hbm [shape: f32[2,16,512], index: 6, kind: output, shape index: {}, may-alias: {0,6}]  }
   0x1   :  { %12 = vsyncpa [#allocation4], 0  ;;  %s17_s23 = sshll.u32 %s837_s0, 4  ;;  %s499_s24 = smov [#allocation2]   ;;  %s18_s23 = int_to_ptr.hbm [resolvable:$true] %s17_s23 }
   0x2   :  { %s19_s25 = sshll.u32 %s499_s24, 4  ;;  %s500_s26 = smov 512   ;;  %s20_s25 = int_to_ptr.vmem [resolvable:$true] %s19_s25 }
   0x3   :  { %s501_s27 = smov 32  }
   0x4   :  { %25 = dma.hbm_to_vmem [thread:$0]  %s18_s23, 2048, %s20_s25, [#allocation3], %s500_s26, %s500_s26, %s501_s27  }
   0x5   :  { %495 = dma.done.wait [#allocation3], 2048  }
   0x6   :  { %496 = vsyncadd [#allocation3], 4294965248  ;;  %v159_v0 = vld [vmem:[%s838_s1 + $0x178] sm:$0xff]  ;;  %v158_v1 = vld [vmem:[%s838_s1 + $0x170] sm:$0xff]  ;;  %vm184_vm0 = vcmask 1041409   ;;  %vm281_vm1 = vcmask 261120  }
   0x7   :  { %v175_v2 = vld [vmem:[%s838_s1 + $0x1f8] sm:$0xff]  ;;  %233 = vmatpush.msra.mxu2 %v159_v0  ;;  %v157_v5 = vld [vmem:[%s838_s1 + $0x168] sm:$0xff]  ;;  %v174_v6 = vld [vmem:[%s838_s1 + $0x1f0] sm:$0xff]  ;;  %vm311_vm2 = vcmask 64512   ;;  %s502_s29 = smov 96   ;;  %vm350_vm3 = vcmask 523264  }
   0x8   :  { %253 = vmatpush.msra.mxu3 %v175_v2  ;;  %v127_v3 = vld [vmem:[%s838_s1 + $0x78] sm:$0xff]  ;;  %v126_v7 = vld [vmem:[%s838_s1 + $0x70] sm:$0xff]  ;;  %v173_v9 = vld [vmem:[%s838_s1 + $0x1e8] sm:$0xff]  ;;  %vm352_vm4 = vcmask 785408   ;;  %vm358_vm5 = vcmask 1040384   ;;  %vm360_vm6 = vcmask 1042434  }
   0x9   :  { %v143_v4 = vld [vmem:[%s838_s1 + $0xf8] sm:$0xff]  ;;  %193 = vmatpush.msra.mxu0 %v127_v3  ;;  %v142_v8 = vld [vmem:[%s838_s1 + $0xf0] sm:$0xff]  ;;  %234 = vmatpush.msra.mxu2 %v158_v1  ;;  %v125_v10 = vld [vmem:[%s838_s1 + $0x68] sm:$0xff]  ;;  %vm362_vm7 = vcmask 1041408   ;;  %vm365_vm8 = vcmask 1043459   ;;  %vm367_vm9 = vcmask 1042433  }
   0xa   :  { %213 = vmatpush.msra.mxu1 %v143_v4  ;;  %254 = vmatpush.msra.mxu3 %v174_v6  ;;  %v156_v11 = vld [vmem:[%s838_s1 + $0x160] sm:$0xff]  ;;  %v141_v12 = vld [vmem:[%s838_s1 + $0xe8] sm:$0xff]  ;;  %v155_v16 = vld [vmem:[%s838_s1 + $0x158] sm:$0xff]  ;;  %s424_s8 = sshll.u32 %s843_s6, 4  ;;  %s425_s8 = int_to_ptr.hbm [resolvable:$true] %s424_s8 }
   0xb   :  { %194 = vmatpush.msra.mxu0 %v126_v7  ;;  %v172_v13 = vld [vmem:[%s838_s1 + $0x1e0] sm:$0xff]  ;;  %235 = vmatpush.msra.mxu2 %v157_v5  ;;  %v171_v17 = vld [vmem:[%s838_s1 + $0x1d8] sm:$0xff]  ;;  %v154_v20 = vld [vmem:[%s838_s1 + $0x150] sm:$0xff] }
   0xc   :  { %214 = vmatpush.msra.mxu1 %v142_v8  ;;  %255 = vmatpush.msra.mxu3 %v173_v9  ;;  %v124_v14 = vld [vmem:[%s838_s1 + $0x60] sm:$0xff]  ;;  %v123_v18 = vld [vmem:[%s838_s1 + $0x58] sm:$0xff]  ;;  %v170_v21 = vld [vmem:[%s838_s1 + $0x1d0] sm:$0xff] }
   0xd   :  { %v140_v15 = vld [vmem:[%s838_s1 + $0xe0] sm:$0xff]  ;;  %195 = vmatpush.msra.mxu0 %v125_v10  ;;  %236 = vmatpush.msra.mxu2 %v156_v11  ;;  %v139_v19 = vld [vmem:[%s838_s1 + $0xd8] sm:$0xff]  ;;  %v122_v22 = vld [vmem:[%s838_s1 + $0x50] sm:$0xff] }
   0xe   :  { %215 = vmatpush.msra.mxu1 %v141_v12  ;;  %256 = vmatpush.msra.mxu3 %v172_v13  ;;  %v138_v23 = vld [vmem:[%s838_s1 + $0xd0] sm:$0xff]  ;;  %v153_v24 = vld [vmem:[%s838_s1 + $0x148] sm:$0xff]  ;;  %v152_v28 = vld [vmem:[%s838_s1 + $0x140] sm:$0xff] }
   0xf   :  { %196 = vmatpush.msra.mxu0 %v124_v14  ;;  %237 = vmatpush.msra.mxu2 %v155_v16  ;;  %v169_v25 = vld [vmem:[%s838_s1 + $0x1c8] sm:$0xff]  ;;  %v168_v29 = vld [vmem:[%s838_s1 + $0x1c0] sm:$0xff]  ;;  %v151_v32 = vld [vmem:[%s838_s1 + $0x138] sm:$0xff] }
  0x10   :  { %216 = vmatpush.msra.mxu1 %v140_v15  ;;  %257 = vmatpush.msra.mxu3 %v171_v17  ;;  %v121_v26 = vld [vmem:[%s838_s1 + $0x48] sm:$0xff]  ;;  %v120_v30 = vld [vmem:[%s838_s1 + $0x40] sm:$0xff]  ;;  %v167_v33 = vld [vmem:[%s838_s1 + $0x1b8] sm:$0xff] }
  0x11   :  { %197 = vmatpush.msra.mxu0 %v123_v18  ;;  %238 = vmatpush.msra.mxu2 %v154_v20  ;;  %v137_v27 = vld [vmem:[%s838_s1 + $0xc8] sm:$0xff]  ;;  %v136_v31 = vld [vmem:[%s838_s1 + $0xc0] sm:$0xff]  ;;  %v119_v34 = vld [vmem:[%s838_s1 + $0x38] sm:$0xff] }
  0x12   :  { %217 = vmatpush.msra.mxu1 %v139_v19  ;;  %258 = vmatpush.msra.mxu3 %v170_v21  ;;  %v135_v35 = vld [vmem:[%s838_s1 + $0xb8] sm:$0xff]  ;;  %v150_v36 = vld [vmem:[%s838_s1 + $0x130] sm:$0xff]  ;;  %v149_v37 = vld [vmem:[%s838_s1 + $0x128] sm:$0xff] }
  0x13   :  { %198 = vmatpush.msra.mxu0 %v122_v22  ;;  %239 = vmatpush.msra.mxu2 %v153_v24  ;;  %v166_v38 = vld [vmem:[%s838_s1 + $0x1b0] sm:$0xff]  ;;  %v165_v41 = vld [vmem:[%s838_s1 + $0x1a8] sm:$0xff]  ;;  %v148_v42 = vld [vmem:[%s838_s1 + $0x120] sm:$0xff] }
  0x14   :  { %218 = vmatpush.msra.mxu1 %v138_v23  ;;  %259 = vmatpush.msra.mxu3 %v169_v25  ;;  %v118_v39 = vld [vmem:[%s838_s1 + $0x30] sm:$0xff]  ;;  %v117_v43 = vld [vmem:[%s838_s1 + $0x28] sm:$0xff]  ;;  %v164_v45 = vld [vmem:[%s838_s1 + $0x1a0] sm:$0xff] }
  0x15   :  { %199 = vmatpush.msra.mxu0 %v121_v26  ;;  %240 = vmatpush.msra.mxu2 %v152_v28  ;;  %v134_v40 = vld [vmem:[%s838_s1 + $0xb0] sm:$0xff]  ;;  %v133_v44 = vld [vmem:[%s838_s1 + $0xa8] sm:$0xff]  ;;  %v116_v46 = vld [vmem:[%s838_s1 + $0x20] sm:$0xff] }
  0x16   :  { %219 = vmatpush.msra.mxu1 %v137_v27  ;;  %260 = vmatpush.msra.mxu3 %v168_v29  ;;  %v132_v47 = vld [vmem:[%s838_s1 + $0xa0] sm:$0xff]  ;;  %v690_v48 = vld [vmem:[#allocation2 + $0x10] sm:$0xff]  ;;  %v147_v49 = vld [vmem:[%s838_s1 + $0x118] sm:$0xff] }
  0x17   :  { %200 = vmatpush.msra.mxu0 %v120_v30  ;;  %241 = vmatpush.msra.mxu2 %v151_v32  ;;  %v695_v50 = vld [vmem:[#allocation2 + $0x30] sm:$0xff]  ;;  %v163_v53 = vld [vmem:[%s838_s1 + $0x198] sm:$0xff]  ;;  %v145_v5 = vld [vmem:[%s838_s1 + $0x108] sm:$0xff] }
  0x18   :  { %220 = vmatpush.msra.mxu1 %v136_v31  ;;  %261 = vmatpush.msra.mxu3 %v167_v33  ;;  %v697_v51 = vld [vmem:[#allocation2 + $0x50] sm:$0xff]  ;;  %v115_v54 = vld [vmem:[%s838_s1 + $0x18] sm:$0xff]  ;;  %v70_v56 = vadd.f32 %v695_v50, %v690_v48  ;;  %v161_v6 = vld [vmem:[%s838_s1 + $0x188] sm:$0xff] }
  0x19   :  { %201 = vmatpush.msra.mxu0 %v119_v34  ;;  %242 = vmatpush.msra.mxu2 %v150_v36  ;;  %v699_v52 = vld [vmem:[#allocation2 + $0x70] sm:$0xff]  ;;  %v131_v55 = vld [vmem:[%s838_s1 + $0x98] sm:$0xff]  ;;  %v744_v8 = vld [vmem:[#allocation2] sm:$0xff] }
  0x1a   :  { %221 = vmatpush.msra.mxu1 %v135_v35  ;;  %262 = vmatpush.msra.mxu3 %v166_v38  ;;  %v98_v57 = vadd.f32 %v699_v52, %v697_v51  ;;  %v146_v58 = vld [vmem:[%s838_s1 + $0x110] sm:$0xff]  ;;  %v720_v60 = vld [vmem:[#allocation2 + $0x18] sm:$0xff]  ;;  %v71_v1 = vrot.slane %v70_v56, 4  ;;  %v746_v9 = vld [vmem:[#allocation2 + $0x20] sm:$0xff] }
  0x1b   :  { %202 = vmatpush.msra.mxu0 %v118_v39  ;;  %243 = vmatpush.msra.mxu2 %v149_v37  ;;  %v162_v59 = vld [vmem:[%s838_s1 + $0x190] sm:$0xff]  ;;  %v722_v61 = vld [vmem:[#allocation2 + $0x38] sm:$0xff]  ;;  %v748_v10 = vld [vmem:[#allocation2 + $0x40] sm:$0xff]  ;;  %v56_v15 = vadd.f32 %v746_v9, %v744_v8 }
  0x1c   :  { %222 = vmatpush.msra.mxu1 %v134_v40  ;;  %263 = vmatpush.msra.mxu3 %v165_v41  ;;  %v724_v62 = vld [vmem:[#allocation2 + $0x58] sm:$0xff]  ;;  %v114_v63 = vld [vmem:[%s838_s1 + $0x10] sm:$0xff]  ;;  %v99_v2 = vrot.slane %v98_v57, 4  ;;  %v77_v4 = vadd.f32 %v722_v61, %v720_v60  ;;  %v72_v11 = vadd.f32 %v71_v1, %v70_v56  ;;  %v750_v14 = vld [vmem:[#allocation2 + $0x60] sm:$0xff] }
  0x1d   :  { %203 = vmatpush.msra.mxu0 %v117_v43  ;;  %244 = vmatpush.msra.mxu2 %v148_v42  ;;  %v130_v0 = vld [vmem:[%s838_s1 + $0x90] sm:$0xff]  ;;  %v732_v3 = vld [vmem:[#allocation2 + $0x78] sm:$0xff]  ;;  %v754_v16 = vld [vmem:[#allocation2 + $0x8] sm:$0xff]  ;;  %v84_v20 = vadd.f32 %v750_v14, %v748_v10  ;;  %v57_v28 = vrot.slane %v56_v15, 4 }
  0x1e   :  { %223 = vmatpush.msra.mxu1 %v133_v44  ;;  %264 = vmatpush.msra.mxu3 %v164_v45  ;;  %v105_v7 = vadd.f32 %v732_v3, %v724_v62  ;;  %v100_v12 = vadd.f32 %v99_v2, %v98_v57  ;;  %v78_v13 = vrot.slane %v77_v4, 4  ;;  %v756_v17 = vld [vmem:[#allocation2 + $0x28] sm:$0xff]  ;;  %v73_v24 = vrot.slane %v72_v11, 2  ;;  %v144_v29 = vld [vmem:[%s838_s1 + $0x100] sm:$0xff]  ;;  %v276_v45 = vld [vmem:[%s839_s2 + $0x18] sm:$0xff] }
  0x1f   :  { %204 = vmatpush.msra.mxu0 %v116_v46  ;;  %245 = vmatpush.msra.mxu2 %v147_v49  ;;  %v113_v18 = vld [vmem:[%s838_s1 + $0x8] sm:$0xff]  ;;  %v63_v23 = vadd.f32 %v756_v17, %v754_v16  ;;  %v160_v30 = vld [vmem:[%s838_s1 + $0x180] sm:$0xff]  ;;  %v85_v32 = vrot.slane %v84_v20, 4  ;;  %v58_v40 = vadd.f32 %v57_v28, %v56_v15 }
  0x20   :  { %224 = vmatpush.msra.mxu1 %v132_v47  ;;  %265 = vmatpush.msra.mxu3 %v163_v53  ;;  %v106_v19 = vrot.slane %v105_v7, 4  ;;  %v763_v21 = vld [vmem:[#allocation2 + $0x48] sm:$0xff]  ;;  %v101_v25 = vrot.slane %v100_v12, 2  ;;  %v79_v27 = vadd.f32 %v78_v13, %v77_v4  ;;  %v74_v35 = vadd.f32 %v73_v24, %v72_v11  ;;  %v112_v38 = vld [vmem:[%s838_s1] sm:$0xff] }
  0x21   :  { %205 = vmatpush.msra.mxu0 %v115_v54  ;;  %v765_v22 = vld [vmem:[#allocation2 + $0x68] sm:$0xff]  ;;  %246 = vmatpush.msra.mxu2 %v146_v58  ;;  %v64_v33 = vrot.slane %v63_v23, 4  ;;  %v128_v39 = vld [vmem:[%s838_s1 + $0x80] sm:$0xff]  ;;  %v86_v42 = vadd.f32 %v85_v32, %v84_v20  ;;  %v59_v53 = vrot.slane %v58_v40, 2 }
  0x22   :  { %225 = vmatpush.msra.mxu1 %v131_v55  ;;  %266 = vmatpush.msra.mxu3 %v162_v59  ;;  %v129_v26 = vld [vmem:[%s838_s1 + $0x88] sm:$0xff]  ;;  %v107_v31 = vadd.f32 %v106_v19, %v105_v7  ;;  %v91_v34 = vadd.f32 %v765_v22, %v763_v21  ;;  %v102_v36 = vadd.f32 %v101_v25, %v100_v12  ;;  %v80_v37 = vrot.slane %v79_v27, 2  ;;  %v306_v32 = vld [vmem:[%s841_s4] sm:$0xff] }
  0x23   :  { %206 = vmatpush.msra.mxu0 %v114_v63  ;;  %247 = vmatpush.msra.mxu2 %v145_v5  ;;  %v65_v43 = vadd.f32 %v64_v33, %v63_v23  ;;  %v75_v46 = vrot.slane %v74_v35, 1  ;;  %v87_v55 = vrot.slane %v86_v42, 2 }
  0x24   :  { %226 = vmatpush.msra.mxu1 %v130_v0  ;;  %267 = vmatpush.msra.mxu3 %v161_v6  ;;  %v108_v41 = vrot.slane %v107_v31, 2  ;;  %v92_v44 = vrot.slane %v91_v34, 4  ;;  %v103_v47 = vrot.slane %v102_v36, 1  ;;  %v81_v49 = vadd.f32 %v80_v37, %v79_v27 }
  0x25   :  { %207 = vmatpush.msra.mxu0 %v113_v18  ;;  %248 = vmatpush.msra.mxu2 %v144_v29  ;;  %v66_v56 = vrot.slane %v65_v43, 2  ;;  %v76_v58 = vadd.f32 %v75_v46, %v74_v35  ;;  %v60_v0 = vadd.f32 %v59_v53, %v58_v40  ;;  %v88_v2 = vadd.f32 %v87_v55, %v86_v42  ;;  %v275_v29 = vld [vmem:[%s839_s2 + $0x10] sm:$0xff]  ;;  %v445_v40 = vld [vmem:[%s840_s3] ss:$0 sm:$0xff]  ;;  %s503_s3 = smov 64  }
  0x26   :  { %227 = vmatpush.msra.mxu1 %v129_v26  ;;  %268 = vmatpush.msra.mxu3 %v160_v30  ;;  %v109_v54 = vadd.f32 %v108_v41, %v107_v31  ;;  %v93_v57 = vadd.f32 %v92_v44, %v91_v34  ;;  %v104_v59 = vadd.f32 %v103_v47, %v102_v36  ;;  %v82_v63 = vrot.slane %v81_v49, 1  ;;  %v274_v30 = vld [vmem:[%s839_s2 + $0x8] sm:$0xff]  ;;  %v273_v31 = vld [vmem:[%s839_s2] sm:$0xff] }
  0x27   :  { %208 = vmatpush.msra.mxu0 %v112_v38  ;;  %v67_v4 = vadd.f32 %v66_v56, %v65_v43  ;;  %v61_v11 = vrot.slane %v60_v0, 1  ;;  %v89_v13 = vrot.slane %v88_v2, 1  ;;  %v446_v44 = vld [vmem:[%s842_s5] ss:$0 sm:$0xff]  ;;  %s504_s5 = smov [#allocation5]  }
  0x28   :  { %228 = vmatpush.msra.mxu1 %v128_v39  ;;  %v110_v1 = vrot.slane %v109_v54, 1  ;;  %v94_v5 = vrot.slane %v93_v57, 2  ;;  %v187_v6 = vsel %vm184_vm0, %v104_v59, %v76_v58  ;;  %v83_v7 = vadd.f32 %v82_v63, %v81_v49  ;;  %s422_s30 = sshll.u32 %s504_s5, 4  ;;  %s423_s30 = int_to_ptr.vmem [resolvable:$true] %s422_s30 }
  0x29   :  { %297 = vmatpush.msrb.mxu0 %v276_v45  ;;  %249 = vmatmul.f32.vlgmr.msra.gmra.mxu2 %v187_v6  ;;  %v68_v15 = vrot.slane %v67_v4, 1  ;;  %v62_v19 = vadd.f32 %v61_v11, %v60_v0  ;;  %v90_v23 = vadd.f32 %v89_v13, %v88_v2 }
  0x2a   :  { %v111_v12 = vadd.f32 %v110_v1, %v109_v54  ;;  %v95_v18 = vadd.f32 %v94_v5, %v93_v57  ;;  %330 = vmatpush.msrb.mxu1 %v306_v32 }
  0x2b   :  { %v69_v24 = vadd.f32 %v68_v15, %v67_v4  ;;  %v185_v26 = vsel %vm184_vm0, %v90_v23, %v62_v19  ;;  %298 = vmatpush.msrb.mxu0 %v275_v29 }
  0x2c   :  { %v188_v20 = vsel %vm184_vm0, %v111_v12, %v83_v7  ;;  %v96_v25 = vrot.slane %v95_v18, 1  ;;  %209 = vmatmul.f32.vlgmr.msra.gmra.mxu0 %v185_v26 }
  0x2d   :  { %269 = vmatmul.f32.vlgmr.msra.gmra.mxu3 %v188_v20  ;;  %299 = vmatpush.msrb.mxu0 %v274_v30 }
  0x2e   :  { %v97_v27 = vadd.f32 %v96_v25, %v95_v18 }
  0x2f   :  { %300 = vmatpush.msrb.mxu0 %v273_v31 }
  0x30   :  { %v186_v28 = vsel %vm184_vm0, %v97_v27, %v69_v24 }
  0x31   :  { %229 = vmatmul.f32.vlgmr.msra.gmra.mxu1 %v186_v28 }
  0xa9   :  { %v210_v33 = vpop.f32.mrf.mxu0 }
  0xac   :  { %v250_v35 = vpop.f32.mrf.mxu2 }
  0xae   :  { %v230_v34 = vpop.f32.mrf.mxu1 }
  0xaf   :  { %v231_v36 = vadd.f32 %v230_v34, %v210_v33 }
  0xb0   :  { %v270_v37 = vpop.f32.mrf.mxu3 }
  0xb1   :  { %v251_v38 = vadd.f32 %v250_v35, %v231_v36 }
  0xb3   :  { %v271_v39 = vadd.f32 %v270_v37, %v251_v38 }
  0xb5   :  { %437 = vmatmul.msk.f32.vlgmr.msrb.gmra.mxu0 %vm281_vm1, %v271_v39 }
 0x132   :  { %v302_v41 = vpop.f32.mrf.mxu0 }
 0x133   :  { %v303_v42 = vadd.f32 %v445_v40, %v302_v41 }
 0x135   :  { %v305_v43 = vmax.f32 %v303_v42, 0.0 }
 0x137   :  { %438 = vmatmul.msk.f32.vlgmr.msrb.gmra.mxu1 %vm311_vm2, %v305_v43 }
 0x1b4   :  { %v332_v45 = vpop.f32.mrf.mxu1 }
 0x1b5   :  { %v333_v46 = vadd.f32 %v446_v44, %v332_v45 }
 0x1b7   :  { %v335_v47 = vadd.f32 3.0, %v333_v46 }
 0x1b9   :  { %v336_v49 = vmax.f32 %v335_v47, 0.0 }
 0x1bb   :  { %v337_v53 = vmin.f32 %v336_v49, 6.0 }
 0x1bd   :  { %v338_v54 = vmul.f32 0.16666667, %v337_v53 }
 0x1bf   :  { %346 = vrot.lane.b32.xlu1 %v338_v54, %s502_s29  ;;  %340 = vrot.lane.b32.xlu0 %v338_v54, %s501_s27 }
 0x1c7   :  { %343 = vrot.lane.b32.xlu0 %v338_v54, %s503_s3 }
 0x231   :  { %v341_v55 = vpop.permute.xlu0 %340  ;;  %v347_v58 = vpop.permute.xlu1 %346 }
 0x232   :  { %v349_v56 = vsel %vm281_vm1, %v338_v54, %v341_v55 }
 0x239   :  { %v344_v57 = vpop.permute.xlu0 %343 }
 0x23a   :  { %v351_v59 = vsel %vm350_vm3, %v349_v56, %v344_v57 }
 0x23b   :  { %v353_v63 = vsel %vm352_vm4, %v351_v59, %v347_v58 }
 0x23c   :  { %v355_v0 = vrot.slane %v353_v63, 7  ;;  %v356_v1 = vrot.slane %v353_v63, 6  ;;  %v357_v2 = vrot.slane %v353_v63, 5 }
 0x23e   :  { %v359_v4 = vsel %vm358_vm5, %v353_v63, %v355_v0  ;;  %v361_v5 = vsel %vm360_vm6, %v356_v1, %v357_v2  ;;  %v364_v6 = vsel %vm184_vm0, %v353_v63, %v355_v0  ;;  %v366_v7 = vsel %vm365_vm8, %v356_v1, %v357_v2 }
 0x23f   :  { %v363_v11 = vsel %vm362_vm7, %v359_v4, %v361_v5  ;;  %v368_v12 = vsel %vm367_vm9, %v364_v6, %v366_v7 }
 0x240   :  { %v370_v13 = vperm.slane %v363_v11, 0  ;;  %v371_v15 = vperm.slane %v363_v11, 1  ;;  %v372_v18 = vperm.slane %v363_v11, 2  ;;  %v369_v19 = vrot.slane %v368_v12, 1 }
 0x241   :  { %v373_v20 = vperm.slane %v363_v11, 3 }
 0x242   :  { %v386_v23 = vmul.f32 %v370_v13, %v744_v8  ;;  %v387_v24 = vmul.f32 %v371_v15, %v754_v16  ;;  %v388_v25 = vmul.f32 %v372_v18, %v690_v48  ;;  %v374_v27 = vperm.slane %v369_v19, 0 }
 0x243   :  { %v389_v26 = vmul.f32 %v373_v20, %v720_v60  ;;  %v390_v28 = vmul.f32 %v370_v13, %v746_v9  ;;  %v375_v29 = vperm.slane %v369_v19, 1  ;;  %v391_v30 = vmul.f32 %v371_v15, %v756_v17 }
 0x244   :  { %402 = vst [vmem:[#allocation5] sm:$0xff] %v386_v23  ;;  %v376_v31 = vperm.slane %v369_v19, 2  ;;  %v392_v32 = vmul.f32 %v372_v18, %v695_v50  ;;  %v377_v33 = vperm.slane %v369_v19, 3  ;;  %v393_v8 = vmul.f32 %v373_v20, %v722_v61 }
 0x245   :  { %403 = vst [vmem:[#allocation5 + $0x8] sm:$0xff] %v387_v24  ;;  %v394_v48 = vmul.f32 %v374_v27, %v748_v10  ;;  %v395_v60 = vmul.f32 %v375_v29, %v763_v21  ;;  %v398_v17 = vmul.f32 %v374_v27, %v750_v14  ;;  %v399_v50 = vmul.f32 %v375_v29, %v765_v22 }
 0x246   :  { %404 = vst [vmem:[#allocation5 + $0x10] sm:$0xff] %v388_v25  ;;  %v396_v9 = vmul.f32 %v376_v31, %v697_v51  ;;  %v397_v16 = vmul.f32 %v377_v33, %v724_v62  ;;  %v400_v61 = vmul.f32 %v376_v31, %v699_v52  ;;  %v401_v51 = vmul.f32 %v377_v33, %v732_v3 }
 0x247   :  { %405 = vst [vmem:[#allocation5 + $0x18] sm:$0xff] %v389_v26 }
 0x248   :  { %406 = vst [vmem:[#allocation5 + $0x20] sm:$0xff] %v390_v28 }
 0x249   :  { %407 = vst [vmem:[#allocation5 + $0x28] sm:$0xff] %v391_v30 }
 0x24a   :  { %408 = vst [vmem:[#allocation5 + $0x30] sm:$0xff] %v392_v32 }
 0x24b   :  { %409 = vst [vmem:[#allocation5 + $0x38] sm:$0xff] %v393_v8 }
 0x24c   :  { %410 = vst [vmem:[#allocation5 + $0x40] sm:$0xff] %v394_v48 }
 0x24d   :  { %411 = vst [vmem:[#allocation5 + $0x48] sm:$0xff] %v395_v60 }
 0x24e   :  { %412 = vst [vmem:[#allocation5 + $0x50] sm:$0xff] %v396_v9 }
 0x24f   :  { %413 = vst [vmem:[#allocation5 + $0x58] sm:$0xff] %v397_v16 }
 0x250   :  { %414 = vst [vmem:[#allocation5 + $0x60] sm:$0xff] %v398_v17 }
 0x251   :  { %415 = vst [vmem:[#allocation5 + $0x68] sm:$0xff] %v399_v50 }
 0x252   :  { %416 = vst [vmem:[#allocation5 + $0x70] sm:$0xff] %v400_v61 }
 0x253   :  { %417 = vst [vmem:[#allocation5 + $0x78] sm:$0xff] %v401_v51 }
 0x254   :  { %430 = dma.vmem_to_hbm [thread:$0]  %s423_s30, 2048, %s425_s8, [#allocation4], %s500_s26, %s500_s26, %s501_s27  }
 0x255   :  { %497 = dma.done.wait [#allocation4], 2048  }
 0x256   :  { %498 = vsyncadd [#allocation4], 4294965248 }
 0x257   :  { %435 = vsyncpa [#allocation3], 1 }
 0x258   :  { %436 = vsyncpa [#allocation4], 1 }

</bundles_post_ra>
